<compile_context>
chip_gen: v5e
topology: v5e:2x2
jax: 0.10.0
libtpu: 0.0.40
codegen_flags: <defaults>
</compile_context>

<pallas_src>
import functools

import jax
import jax.numpy as jnp
from jax.experimental import pallas as pl
from jax.experimental.pallas import tpu as pltpu


def _round_up(x, m):
    return ((x + m - 1) // m) * m


def _cdiv(a, b):
    return -(-a // b)


def _pad2d(a, rows, cols):
    r, c = a.shape
    return jnp.pad(a, ((0, rows - r), (0, cols - c)))


# ---------------------------------------------------------------------------
# Kernel 1 (one-time, hoisted): fold the activation-free layer chain.
# Runs at the true (unpadded) widths; whole arrays live in VMEM.
# ---------------------------------------------------------------------------
def _fold_kernel(n_layers, w0_ref, wrest_ref, b_ref, wtot_ref, btot_ref):
    w = w0_ref[...]                                   # (F, width) f32
    b = b_ref[0]                                      # (1, width) f32
    for l in range(1, n_layers):                      # static unroll; runs once
        wl = wrest_ref[l - 1]                         # (width, width) f32
        w = jnp.dot(w, wl, preferred_element_type=jnp.float32)
        b = jnp.dot(b, wl, preferred_element_type=jnp.float32) + b_ref[l]
    wtot_ref[...] = w
    btot_ref[...] = b


def prepare_params(weights, biases):
    """One-time parameter fold + layout prep (call once, reuse every forward)."""
    n_layers = len(weights)
    F = weights[0].shape[0]
    width = weights[-1].shape[1]
    use_bias = biases is not None

    if n_layers > 1:
        # Fold assumes uniform hidden width (true for this module: width_dl).
        assert all(w.shape == (width, width) for w in weights[1:]), \
            "parameter fold assumes uniform hidden width"

    if use_bias:
        b_stack = jnp.stack(
            [b.astype(jnp.float32).reshape(1, width) for b in biases])
    else:
        b_stack = jnp.zeros((n_layers, 1, width), jnp.float32)

    w0 = weights[0].astype(jnp.float32)
    if n_layers == 1:
        w_total, b_total = w0, b_stack[0]
    else:
        wrest = jnp.stack([w.astype(jnp.float32) for w in weights[1:]])
        vmem = pl.BlockSpec(memory_space=pltpu.MemorySpace.VMEM)
        w_total, b_total = pl.pallas_call(
            functools.partial(_fold_kernel, n_layers),
            out_shape=(jax.ShapeDtypeStruct((F, width), jnp.float32),
                       jax.ShapeDtypeStruct((1, width), jnp.float32)),
            in_specs=[vmem, vmem, vmem],
            out_specs=(vmem, vmem),
        )(w0, wrest, b_stack)

    F_pad = _round_up(F, 128)                 # lane-aligned contraction dim
    W_pad = _round_up(width, 128)             # lane-dense output (unmasked vst)
    return {
        "w": _pad2d(w_total, F_pad, W_pad).astype(jnp.bfloat16),  # bf16 MXU input
        "b": _pad2d(b_total, 1, W_pad),                           # f32 bias
        "F": F, "width": width, "F_pad": F_pad, "W_pad": W_pad,
    }


# ---------------------------------------------------------------------------
# Kernel 2 (hot path): batch-gridded GEMM + bias.
# x arrives f32, cast to bf16 in-kernel (free VALU work under a mem-bound op).
# ---------------------------------------------------------------------------
def _gemm_bias_kernel(x_ref, w_ref, b_ref, o_ref):
    acc = jnp.dot(x_ref[...].astype(jnp.bfloat16), w_ref[...],
                  preferred_element_type=jnp.float32)
    o_ref[...] = (acc + b_ref[...]).astype(o_ref.dtype)


def _choose_batch_tiling(B):
    """8-sublane aligned tile, <=512 rows, minimal pad, >=2 tiles when B >= 16
    (so v7x's second TensorCore gets a share of the 'parallel' axis)."""
    B8 = _round_up(B, 8)
    if B8 <= 8:
        return 8, 8
    n_tiles = max(2, _cdiv(B8, 512))
    TB = _round_up(_cdiv(B8, n_tiles), 8)
    return TB, n_tiles * TB


def deep_linear_forward(x_nchw, prepared):
    """x_nchw: (B, 1, H, W) f32. prepared: output of prepare_params()."""
    B = x_nchw.shape[0]
    x_flat = x_nchw.reshape(B, -1)            # row-major flatten == torch .view
    F, width = prepared["F"], prepared["width"]
    F_pad, W_pad = prepared["F_pad"], prepared["W_pad"]
    assert x_flat.shape[1] == F

    TB, B_pad = _choose_batch_tiling(B)
    if (B_pad, F_pad) != (B, F):
        # f32 zero-pad only where needed (no bf16 copy of x is materialized).
        x_flat = jnp.pad(x_flat, ((0, B_pad - B), (0, F_pad - F)))

    # Honest VMEM budget: double-buffered x/out tiles + resident W/b + headroom.
    vmem_est = (2 * TB * F_pad * 4          # x tiles (f32)
                + 2 * TB * W_pad * 4        # out tiles (f32)
                + 2 * F_pad * W_pad * 2     # W_total (bf16)
                + 2 * W_pad * 4)            # bias
    vmem_limit = int(vmem_est + (4 << 20))

    out_p = pl.pallas_call(
        _gemm_bias_kernel,
        out_shape=jax.ShapeDtypeStruct((B_pad, W_pad), jnp.float32),
        grid_spec=pltpu.PrefetchScalarGridSpec(
            num_scalar_prefetch=0,
            grid=(B_pad // TB,),
            in_specs=[
                pl.BlockSpec((TB, F_pad), lambda i: (i, 0)),      # x batch tile
                pl.BlockSpec((F_pad, W_pad), lambda i: (0, 0)),   # resident W_total
                pl.BlockSpec((1, W_pad), lambda i: (0, 0)),       # resident b_total
            ],
            out_specs=pl.BlockSpec((TB, W_pad), lambda i: (i, 0)),
        ),
        compiler_params=pltpu.CompilerParams(
            dimension_semantics=("parallel",),
            vmem_limit_bytes=vmem_limit,
        ),
    )(x_flat, prepared["w"], prepared["b"])

    # Slice off batch / lane padding (keeps torch-like (B, width) f32 output).
    return out_p[:B, :width]


def init_params(key, input_shape, width, depth, use_bias):
    """Deterministic synthetic parameter init (shapes match the torch module)."""
    assert input_shape[0] == 1
    in_features = 1
    for d in input_shape:
        in_features *= int(d)
    dims = [in_features] + [width] * (depth - 1)

    weights, biases = [], ([] if use_bias else None)
    for l in range(depth - 1):
        key, wk, bk = jax.random.split(key, 3)
        bound = 1.0 / (dims[l] ** 0.5)
        w = jax.random.uniform(
            wk, (dims[l], dims[l + 1]), jnp.float32, minval=-bound, maxval=bound)
        weights.append(w)
        if use_bias:
            biases.append(jax.random.uniform(
                bk, (dims[l + 1],), jnp.float32, minval=-bound, maxval=bound))
    return weights, biases


if __name__ == "__main__":
    # Config consistent with the torch module:
    #   input_shape = (1, 16, 16) -> 256 input features
    #   width_dl = 32, depth_dl = 3 -> layers: 256->32, 32->32
    config = {
        "input_shape": (1, 16, 16),
        "n_classes": 10,       # unused by forward (matches reference module)
        "width_dl": 32,
        "depth_dl": 3,
        "use_bias_dl": True,
    }
    B = 2

    key = jax.random.PRNGKey(0)
    key, xk, pk = jax.random.split(key, 3)
    x = jax.random.normal(xk, (B,) + tuple(config["input_shape"]), jnp.float32)

    weights, biases = init_params(
        pk, config["input_shape"], config["width_dl"], config["depth_dl"],
        config["use_bias_dl"],
    )

    # One-time prep (fold + pad + bf16 cast) — hoisted off the forward path.
    prepared = prepare_params(weights, biases)
    fwd = jax.jit(lambda xb: deep_linear_forward(xb, prepared))

    out = jax.block_until_ready(fwd(x))

    # Pure-JAX f32 reference of the original (un-folded) math.
    ref = x.reshape(B, -1)
    for l in range(len(weights)):
        ref = ref @ weights[l]
        if biases is not None:
            ref = ref + biases[l]

    assert out.shape == (B, config["width_dl"])
    # bf16 MXU inputs (f32 accumulate) -> small relative error vs f32 reference.
    assert jnp.allclose(out, ref, atol=2e-2, rtol=2e-2), \
        float(jnp.max(jnp.abs(out - ref)))

    print("KERNEL_OK")
</pallas_src>

<mosaic_0001>
module attributes {stable_mosaic.version = 11 : i64} {
  func.func @_fold_kernel(%arg0: memref<256x32xf32, #tpu.memory_space<vmem>>, %arg1: memref<1x32x32xf32, #tpu.memory_space<vmem>>, %arg2: memref<2x1x32xf32, #tpu.memory_space<vmem>>, %arg3: memref<256x32xf32, #tpu.memory_space<vmem>>, %arg4: memref<1x32xf32, #tpu.memory_space<vmem>>) attributes {dimension_semantics = [], scalar_prefetch = 0 : i64, scratch_operands = 0 : i64, tpu.core_type = #tpu.core_type<tc>} {
    %c0 = arith.constant 0 : index
    %c0_0 = arith.constant 0 : index
    %0 = vector.load %arg0[%c0, %c0_0] : memref<256x32xf32, #tpu.memory_space<vmem>>, vector<256x32xf32>
    %c0_1 = arith.constant 0 : index
    %c0_2 = arith.constant 0 : index
    %c0_3 = arith.constant 0 : index
    %1 = vector.load %arg2[%c0_1, %c0_2, %c0_3] : memref<2x1x32xf32, #tpu.memory_space<vmem>>, vector<1x1x32xf32>
    %2 = vector.shape_cast %1 : vector<1x1x32xf32> to vector<1x32xf32>
    %c0_4 = arith.constant 0 : index
    %c0_5 = arith.constant 0 : index
    %c0_6 = arith.constant 0 : index
    %3 = vector.load %arg1[%c0_4, %c0_5, %c0_6] : memref<1x32x32xf32, #tpu.memory_space<vmem>>, vector<1x32x32xf32>
    %4 = vector.shape_cast %3 : vector<1x32x32xf32> to vector<32x32xf32>
    %cst = arith.constant dense<0.000000e+00> : vector<256x32xf32>
    %5 = tpu.matmul %0, %4, %cst {dimension_numbers = #tpu.dot_dimension_numbers<[1], [0], [0], [1], [0, 0, 1, 1], [], []>} : vector<256x32xf32>, vector<32x32xf32>, vector<256x32xf32> -> vector<256x32xf32>
    %cst_7 = arith.constant dense<0.000000e+00> : vector<1x32xf32>
    %6 = tpu.matmul %2, %4, %cst_7 {dimension_numbers = #tpu.dot_dimension_numbers<[1], [0], [0], [1], [0, 0, 1, 1], [], []>} : vector<1x32xf32>, vector<32x32xf32>, vector<1x32xf32> -> vector<1x32xf32>
    %c1 = arith.constant 1 : index
    %c0_8 = arith.constant 0 : index
    %c0_9 = arith.constant 0 : index
    %7 = vector.load %arg2[%c1, %c0_8, %c0_9] : memref<2x1x32xf32, #tpu.memory_space<vmem>>, vector<1x1x32xf32>
    %8 = vector.shape_cast %7 : vector<1x1x32xf32> to vector<1x32xf32>
    %9 = arith.addf %6, %8 : vector<1x32xf32>
    %c0_10 = arith.constant 0 : index
    %c0_11 = arith.constant 0 : index
    %10 = vector.load %arg3[%c0_10, %c0_11] : memref<256x32xf32, #tpu.memory_space<vmem>>, vector<256x32xf32>
    tpu.vector_store %arg3[%c0_10, %c0_11], %5 {strides = array<i32>} : memref<256x32xf32, #tpu.memory_space<vmem>>, vector<256x32xf32>,
    %c0_12 = arith.constant 0 : index
    %c0_13 = arith.constant 0 : index
    %11 = vector.load %arg4[%c0_12, %c0_13] : memref<1x32xf32, #tpu.memory_space<vmem>>, vector<1x32xf32>
    tpu.vector_store %arg4[%c0_12, %c0_13], %9 {strides = array<i32>} : memref<1x32xf32, #tpu.memory_space<vmem>>, vector<1x32xf32>,
    return
  }
}

</mosaic_0001>

<bundles_post_ra>
// kernel: tpu_custom_call.1
= control target key start
LH: loop header
LB: loop body
LE: loop exit
PB: predicated region body
PF: predicated region fallthrough
CT: control target
= control target key end

     0   :  { %vm54_vm0 = vcmask 261120   ;;  %s720_s0 = inlined_call_operand.vmem [shape: f32[256,32], index: 0, kind: input, shape index: {}]   ;;  %s721_s1 = inlined_call_operand.vmem [shape: f32[1,32,32], index: 1, kind: input, shape index: {}]   ;;  %s722_s2 = inlined_call_operand.vmem [shape: f32[2,1,32], index: 2, kind: input, shape index: {}]   ;;  %s723_s3 = inlined_call_operand.vmem [shape: f32[256,32], index: 3, kind: output, shape index: {0}]   ;;  %s724_s4 = inlined_call_operand.hbm [shape: f32[1,32], index: 4, kind: output, shape index: {1}]  }
   0x1   :  { %v53_v0 = vld [vmem:[%s721_s1 + $0x18] sm:$0xff]  ;;  %v52_v1 = vld [vmem:[%s721_s1 + $0x10] sm:$0xff]  ;;  %v51_v2 = vld [vmem:[%s721_s1 + $0x8] sm:$0xff] }
   0x2   :  { %378 = vmatpush.msra.mxu2 %v53_v0  ;;  %379 = vmatpush.msra.mxu3 %v53_v0  ;;  %v50_v3 = vld [vmem:[%s721_s1] sm:$0xff]  ;;  %v31_v4 = vld [vmem:[%s720_s0 + $0x70] sm:$0xff]  ;;  %v40_v5 = vld [vmem:[%s720_s0 + $0xb8] sm:$0xff] }
   0x3   :  { %163 = vmatpush.msra.mxu0 %v53_v0  ;;  %377 = vmatpush.msra.mxu1 %v53_v0 }
   0x4   :  { %381 = vmatpush.msra.mxu2 %v52_v1  ;;  %382 = vmatpush.msra.mxu3 %v52_v1 }
   0x5   :  { %164 = vmatpush.msra.mxu0 %v52_v1  ;;  %380 = vmatpush.msra.mxu1 %v52_v1 }
   0x6   :  { %384 = vmatpush.msra.mxu2 %v51_v2  ;;  %385 = vmatpush.msra.mxu3 %v51_v2 }
   0x7   :  { %165 = vmatpush.msra.mxu0 %v51_v2  ;;  %383 = vmatpush.msra.mxu1 %v51_v2 }
   0x8   :  { %10 = vsyncpa [#allocation3], 0  ;;  %387 = vmatpush.msra.mxu2 %v50_v3  ;;  %388 = vmatpush.msra.mxu3 %v50_v3  ;;  %v17_v6 = vld [vmem:[%s720_s0] sm:$0xff]  ;;  %v32_v8 = vld [vmem:[%s720_s0 + $0x78] sm:$0xff]  ;;  %s416_s28 = smov [#allocation2]   ;;  %s332_s6 = sshll.u32 %s724_s4, 4  ;;  %s333_s6 = int_to_ptr.hbm [resolvable:$true] %s332_s6 }
   0x9   :  { %v25_v7 = vld [vmem:[%s720_s0 + $0x40] sm:$0xff]  ;;  %357 = vmatmul.msk.f32.vlgmr.msra.gmra.mxu2 %vm54_vm0, %v31_v4  ;;  %366 = vmatmul.msk.f32.vlgmr.msra.gmra.mxu3 %vm54_vm0, %v40_v5  ;;  %v18_v10 = vld [vmem:[%s720_s0 + $0x8] sm:$0xff]  ;;  %v19_v14 = vld [vmem:[%s720_s0 + $0x10] sm:$0xff]  ;;  %s330_s29 = sshll.u32 %s416_s28, 4  ;;  %vm321_vm1 = vcmask 253952   ;;  %s331_s29 = int_to_ptr.vmem [resolvable:$true] %s330_s29 }
   0xa   :  { %166 = vmatpush.msra.mxu0 %v50_v3  ;;  %386 = vmatpush.msra.mxu1 %v50_v3  ;;  %v41_v9 = vld [vmem:[%s720_s0 + $0xc0] sm:$0xff]  ;;  %v26_v11 = vld [vmem:[%s720_s0 + $0x48] sm:$0xff]  ;;  %v27_v15 = vld [vmem:[%s720_s0 + $0x50] sm:$0xff] }
   0xb   :  { %343 = vmatmul.msk.f32.vlgmr.msra.gmra.mxu0 %vm54_vm0, %v17_v6  ;;  %351 = vmatmul.msk.f32.vlgmr.msra.gmra.mxu1 %vm54_vm0, %v25_v7  ;;  %v33_v12 = vld [vmem:[%s720_s0 + $0x80] sm:$0xff]  ;;  %v42_v13 = vld [vmem:[%s720_s0 + $0xc8] sm:$0xff]  ;;  %v43_v17 = vld [vmem:[%s720_s0 + $0xd0] sm:$0xff] }
   0xc   :  { %281 = vmatpush.msrb.mxu1 %v53_v0  ;;  %v34_v16 = vld [vmem:[%s720_s0 + $0x88] sm:$0xff]  ;;  %v20_v18 = vld [vmem:[%s720_s0 + $0x18] sm:$0xff]  ;;  %v35_v20 = vld [vmem:[%s720_s0 + $0x90] sm:$0xff] }
   0xd   :  { %v28_v19 = vld [vmem:[%s720_s0 + $0x58] sm:$0xff]  ;;  %v21_v22 = vld [vmem:[%s720_s0 + $0x20] sm:$0xff]  ;;  %v22_v26 = vld [vmem:[%s720_s0 + $0x28] sm:$0xff] }
   0xe   :  { %282 = vmatpush.msrb.mxu1 %v52_v1  ;;  %v44_v21 = vld [vmem:[%s720_s0 + $0xd8] sm:$0xff]  ;;  %v29_v23 = vld [vmem:[%s720_s0 + $0x60] sm:$0xff]  ;;  %v30_v27 = vld [vmem:[%s720_s0 + $0x68] sm:$0xff] }
   0xf   :  { %v36_v24 = vld [vmem:[%s720_s0 + $0x98] sm:$0xff]  ;;  %v45_v25 = vld [vmem:[%s720_s0 + $0xe0] sm:$0xff]  ;;  %v46_v29 = vld [vmem:[%s720_s0 + $0xe8] sm:$0xff] }
  0x10   :  { %283 = vmatpush.msrb.mxu1 %v51_v2  ;;  %v37_v28 = vld [vmem:[%s720_s0 + $0xa0] sm:$0xff]  ;;  %v23_v30 = vld [vmem:[%s720_s0 + $0x30] sm:$0xff]  ;;  %v38_v32 = vld [vmem:[%s720_s0 + $0xa8] sm:$0xff] }
  0x11   :  { %358 = vmatmul.msk.f32.gmra.mxu2 %vm54_vm0, %v32_v8  ;;  %367 = vmatmul.msk.f32.gmra.mxu3 %vm54_vm0, %v41_v9  ;;  %v49_v31 = vld [vmem:[%s722_s2] sm:$0x1]  ;;  %v47_v33 = vld [vmem:[%s720_s0 + $0xf0] sm:$0xff]  ;;  %v24_v34 = vld [vmem:[%s720_s0 + $0x38] sm:$0xff] }
  0x12   :  { %284 = vmatpush.msrb.mxu1 %v50_v3  ;;  %v39_v35 = vld [vmem:[%s720_s0 + $0xb0] sm:$0xff]  ;;  %v48_v36 = vld [vmem:[%s720_s0 + $0xf8] sm:$0xff]  ;;  %v375_v61 = vld [vmem:[%s722_s2 + $0x1] sm:$0x1] }
  0x13   :  { %344 = vmatmul.msk.f32.gmra.mxu0 %vm54_vm0, %v18_v10  ;;  %352 = vmatmul.msk.f32.gmra.mxu1 %vm54_vm0, %v26_v11 }
  0x19   :  { %359 = vmatmul.msk.f32.gmra.mxu2 %vm54_vm0, %v33_v12  ;;  %368 = vmatmul.msk.f32.gmra.mxu3 %vm54_vm0, %v42_v13 }
  0x1b   :  { %345 = vmatmul.msk.f32.gmra.mxu0 %vm54_vm0, %v19_v14  ;;  %353 = vmatmul.msk.f32.gmra.mxu1 %vm54_vm0, %v27_v15 }
  0x21   :  { %360 = vmatmul.msk.f32.gmra.mxu2 %vm54_vm0, %v34_v16  ;;  %369 = vmatmul.msk.f32.gmra.mxu3 %vm54_vm0, %v43_v17 }
  0x23   :  { %346 = vmatmul.msk.f32.gmra.mxu0 %vm54_vm0, %v20_v18  ;;  %354 = vmatmul.msk.f32.gmra.mxu1 %vm54_vm0, %v28_v19 }
  0x29   :  { %361 = vmatmul.msk.f32.gmra.mxu2 %vm54_vm0, %v35_v20  ;;  %370 = vmatmul.msk.f32.gmra.mxu3 %vm54_vm0, %v44_v21 }
  0x2b   :  { %347 = vmatmul.msk.f32.gmra.mxu0 %vm54_vm0, %v21_v22  ;;  %355 = vmatmul.msk.f32.gmra.mxu1 %vm54_vm0, %v29_v23 }
  0x31   :  { %362 = vmatmul.msk.f32.gmra.mxu2 %vm54_vm0, %v36_v24  ;;  %371 = vmatmul.msk.f32.gmra.mxu3 %vm54_vm0, %v45_v25 }
  0x33   :  { %348 = vmatmul.msk.f32.gmra.mxu0 %vm54_vm0, %v22_v26  ;;  %356 = vmatmul.msk.f32.gmra.mxu1 %vm54_vm0, %v30_v27 }
  0x39   :  { %363 = vmatmul.msk.f32.gmra.mxu2 %vm54_vm0, %v37_v28  ;;  %372 = vmatmul.msk.f32.gmra.mxu3 %vm54_vm0, %v46_v29 }
  0x3b   :  { %349 = vmatmul.msk.f32.gmra.mxu0 %vm54_vm0, %v23_v30  ;;  %376 = vmatmul.msk.f32.vlgmr.msrb.gmra.mxu1 %vm54_vm0, %v49_v31 }
  0x41   :  { %364 = vmatmul.msk.f32.gmra.mxu2 %vm54_vm0, %v38_v32  ;;  %373 = vmatmul.msk.f32.gmra.mxu3 %vm54_vm0, %v47_v33 }
  0x43   :  { %350 = vmatmul.msk.f32.gmra.mxu0 %vm54_vm0, %v24_v34 }
  0x49   :  { %365 = vmatmul.msk.f32.gmra.mxu2 %vm54_vm0, %v39_v35  ;;  %374 = vmatmul.msk.f32.gmra.mxu3 %vm54_vm0, %v48_v36 }
  0x88   :  { %v168_v37 = vpop.f32.mrf.mxu0  ;;  %v192_v38 = vpop.f32.mrf.mxu1 }
  0x89   :  { %289 = vst.msk [vmem:[%s723_s3] sm:$0xff] %vm54_vm0, %v168_v37 }
  0x8a   :  { %297 = vst.msk [vmem:[%s723_s3 + $0x40] sm:$0xff] %vm54_vm0, %v192_v38 }
  0x8c   :  { %v210_v39 = vpop.f32.mrf.mxu2  ;;  %v237_v40 = vpop.f32.mrf.mxu3 }
  0x8d   :  { %303 = vst.msk [vmem:[%s723_s3 + $0x70] sm:$0xff] %vm54_vm0, %v210_v39 }
  0x8e   :  { %312 = vst.msk [vmem:[%s723_s3 + $0xb8] sm:$0xff] %vm54_vm0, %v237_v40 }
  0x90   :  { %v171_v41 = vpop.f32.mrf.mxu0  ;;  %v195_v42 = vpop.f32.mrf.mxu1 }
  0x91   :  { %290 = vst.msk [vmem:[%s723_s3 + $0x8] sm:$0xff] %vm54_vm0, %v171_v41 }
  0x92   :  { %298 = vst.msk [vmem:[%s723_s3 + $0x48] sm:$0xff] %vm54_vm0, %v195_v42 }
  0x94   :  { %v213_v43 = vpop.f32.mrf.mxu2  ;;  %v240_v44 = vpop.f32.mrf.mxu3 }
  0x95   :  { %304 = vst.msk [vmem:[%s723_s3 + $0x78] sm:$0xff] %vm54_vm0, %v213_v43 }
  0x96   :  { %313 = vst.msk [vmem:[%s723_s3 + $0xc0] sm:$0xff] %vm54_vm0, %v240_v44 }
  0x98   :  { %v174_v45 = vpop.f32.mrf.mxu0  ;;  %v198_v46 = vpop.f32.mrf.mxu1 }
  0x99   :  { %291 = vst.msk [vmem:[%s723_s3 + $0x10] sm:$0xff] %vm54_vm0, %v174_v45 }
  0x9a   :  { %299 = vst.msk [vmem:[%s723_s3 + $0x50] sm:$0xff] %vm54_vm0, %v198_v46 }
  0x9c   :  { %v216_v47 = vpop.f32.mrf.mxu2  ;;  %v243_v48 = vpop.f32.mrf.mxu3 }
  0x9d   :  { %305 = vst.msk [vmem:[%s723_s3 + $0x80] sm:$0xff] %vm54_vm0, %v216_v47 }
  0x9e   :  { %314 = vst.msk [vmem:[%s723_s3 + $0xc8] sm:$0xff] %vm54_vm0, %v243_v48 }
  0xa0   :  { %v177_v49 = vpop.f32.mrf.mxu0  ;;  %v201_v50 = vpop.f32.mrf.mxu1 }
  0xa1   :  { %292 = vst.msk [vmem:[%s723_s3 + $0x18] sm:$0xff] %vm54_vm0, %v177_v49 }
  0xa2   :  { %300 = vst.msk [vmem:[%s723_s3 + $0x58] sm:$0xff] %vm54_vm0, %v201_v50 }
  0xa4   :  { %v219_v51 = vpop.f32.mrf.mxu2  ;;  %v246_v52 = vpop.f32.mrf.mxu3 }
  0xa5   :  { %306 = vst.msk [vmem:[%s723_s3 + $0x88] sm:$0xff] %vm54_vm0, %v219_v51 }
  0xa6   :  { %315 = vst.msk [vmem:[%s723_s3 + $0xd0] sm:$0xff] %vm54_vm0, %v246_v52 }
  0xa8   :  { %v180_v53 = vpop.f32.mrf.mxu0  ;;  %v204_v54 = vpop.f32.mrf.mxu1 }
  0xa9   :  { %293 = vst.msk [vmem:[%s723_s3 + $0x20] sm:$0xff] %vm54_vm0, %v180_v53 }
  0xaa   :  { %301 = vst.msk [vmem:[%s723_s3 + $0x60] sm:$0xff] %vm54_vm0, %v204_v54 }
  0xac   :  { %v222_v55 = vpop.f32.mrf.mxu2  ;;  %v249_v56 = vpop.f32.mrf.mxu3 }
  0xad   :  { %307 = vst.msk [vmem:[%s723_s3 + $0x90] sm:$0xff] %vm54_vm0, %v222_v55 }
  0xae   :  { %316 = vst.msk [vmem:[%s723_s3 + $0xd8] sm:$0xff] %vm54_vm0, %v249_v56 }
  0xb0   :  { %v183_v57 = vpop.f32.mrf.mxu0  ;;  %v207_v58 = vpop.f32.mrf.mxu1 }
  0xb1   :  { %294 = vst.msk [vmem:[%s723_s3 + $0x28] sm:$0xff] %vm54_vm0, %v183_v57 }
  0xb2   :  { %302 = vst.msk [vmem:[%s723_s3 + $0x68] sm:$0xff] %vm54_vm0, %v207_v58 }
  0xb4   :  { %v225_v59 = vpop.f32.mrf.mxu2  ;;  %v252_v60 = vpop.f32.mrf.mxu3 }
  0xb5   :  { %308 = vst.msk [vmem:[%s723_s3 + $0x98] sm:$0xff] %vm54_vm0, %v225_v59 }
  0xb6   :  { %317 = vst.msk [vmem:[%s723_s3 + $0xe0] sm:$0xff] %vm54_vm0, %v252_v60 }
  0xb8   :  { %v186_v62 = vpop.f32.mrf.mxu0  ;;  %v286_v63 = vpop.f32.mrf.mxu1 }
  0xb9   :  { %295 = vst.msk [vmem:[%s723_s3 + $0x30] sm:$0xff] %vm54_vm0, %v186_v62  ;;  %v287_v0 = vadd.f32 %v375_v61, %v286_v63 }
  0xbb   :  { %322 = vst.msk [vmem:[#allocation2] sm:$0x1] %vm321_vm1, %v287_v0 }
  0xbc   :  { %v228_v1 = vpop.f32.mrf.mxu2  ;;  %v255_v2 = vpop.f32.mrf.mxu3  ;;  %335 = dma.vmem_to_hbm [thread:$0]  %s331_s29, 16, %s333_s6, [#allocation3]  }
  0xbd   :  { %309 = vst.msk [vmem:[%s723_s3 + $0xa0] sm:$0xff] %vm54_vm0, %v228_v1 }
  0xbe   :  { %318 = vst.msk [vmem:[%s723_s3 + $0xe8] sm:$0xff] %vm54_vm0, %v255_v2 }
  0xc0   :  { %v189_v3 = vpop.f32.mrf.mxu0 }
  0xc1   :  { %296 = vst.msk [vmem:[%s723_s3 + $0x38] sm:$0xff] %vm54_vm0, %v189_v3 }
  0xc4   :  { %v231_v4 = vpop.f32.mrf.mxu2  ;;  %v258_v5 = vpop.f32.mrf.mxu3 }
  0xc5   :  { %310 = vst.msk [vmem:[%s723_s3 + $0xa8] sm:$0xff] %vm54_vm0, %v231_v4 }
  0xc6   :  { %319 = vst.msk [vmem:[%s723_s3 + $0xf0] sm:$0xff] %vm54_vm0, %v258_v5 }
  0xcc   :  { %v234_v6 = vpop.f32.mrf.mxu2  ;;  %v261_v7 = vpop.f32.mrf.mxu3 }
  0xcd   :  { %311 = vst.msk [vmem:[%s723_s3 + $0xb0] sm:$0xff] %vm54_vm0, %v234_v6 }
  0xce   :  { %320 = vst.msk [vmem:[%s723_s3 + $0xf8] sm:$0xff] %vm54_vm0, %v261_v7 }
  0xcf   :  { %414 = dma.done.wait [#allocation3], 16  }
  0xd0   :  { %415 = vsyncadd [#allocation3], 4294967280 }
  0xd1   :  { %342 = vsyncpa [#allocation3], 1 }

</bundles_post_ra>
